<compile_context>
chip_gen: v7x
topology: tpu7x:2x2x1
jax: 0.10.0
libtpu: 0.0.40
codegen_flags: <defaults>
</compile_context>

<pallas_src>
from functools import partial

import jax
import jax.numpy as jnp
from jax.experimental import pallas as pl
from jax.experimental.pallas import tpu as pltpu


# ---------------------------------------------------------------------------
# Kernel
# ---------------------------------------------------------------------------
def _residual_conv1x1_kernel(x_ref, w_ref, b_ref, o_ref, *, bf16_dot):
    """out = W @ x + b + x, fused.

    x_ref, o_ref: (C, L)   -- L = spatial tile on the lane axis
    w_ref:        (C, C)   -- weight[o, c] of the 1x1 conv
    b_ref:        (C, 1)
    """
    x = x_ref[...]
    xf = x.astype(jnp.float32)
    if bf16_dot:
        # bf16 MXU inputs, f32 accumulation: keeps the kernel HBM-bound at
        # large C on every generation.
        y = jnp.dot(w_ref[...].astype(jnp.bfloat16),
                    x.astype(jnp.bfloat16),
                    preferred_element_type=jnp.float32)
    else:
        y = jnp.dot(w_ref[...].astype(jnp.float32), xf,
                    preferred_element_type=jnp.float32)
    # Epilogue (bias + residual) always in f32.
    o_ref[...] = (y + b_ref[...].astype(jnp.float32) + xf).astype(o_ref.dtype)


# ---------------------------------------------------------------------------
# Tiling / tuning helpers
# ---------------------------------------------------------------------------
def _hw_budgets():
    """(max_block_bytes, vmem_limit_bytes, min_grid_steps) per TPU generation."""
    vmem_phys = None
    try:
        info = pltpu.get_tpu_info()
        for attr in ("vmem_capacity_bytes", "vmem_size_bytes", "vmem_bytes"):
            v = getattr(info, attr, None)
            if v is not None and int(v) > 0:
                vmem_phys = int(v)
                break
    except Exception:
        vmem_phys = None
    if vmem_phys is None:
        vmem_phys = 64 << 20                    # conservative: assume v7x
    if vmem_phys >= (100 << 20):                # v5e / v6e: 128 MiB VMEM
        return (6 << 20, 64 << 20, 8)
    return (3 << 20, 48 << 20, 8)               # v7x: 64 MiB VMEM, 2 TCs


def _pick_tile_hw(hw_pad, c, itemsize, max_block_bytes, n_batch, min_steps):
    """Largest lane-axis tile (multiple of 128, divides hw_pad) keeping one
    (C, tile_hw) block under max_block_bytes, while guaranteeing enough grid
    steps for megacore sharding / pipelining."""
    lanes_budget = (max_block_bytes // max(1, c * itemsize)) // 128 * 128
    t = min(hw_pad, max(128, lanes_budget))
    while hw_pad % t != 0:          # largest multiple of 128 dividing hw_pad
        t -= 128
    # Ensure the grid has enough steps (>= min_steps if possible, >= 2 at
    # minimum) without shrinking blocks into per-step-overhead territory.
    while t > 128:
        steps = n_batch * (hw_pad // t)
        if steps >= min_steps:
            break
        if steps >= 2 and c * t * itemsize <= (1 << 20):
            break
        nt = max(128, (t // 2) // 128 * 128)
        while hw_pad % nt != 0:
            nt -= 128
        if nt >= t:
            break
        t = nt
    return t


# ---------------------------------------------------------------------------
# Wrapper
# ---------------------------------------------------------------------------
@partial(jax.jit,
         static_argnames=("max_block_bytes", "vmem_limit_bytes",
                          "min_grid_steps"))
def _residual_conv1x1_impl(x_nchw, weight, bias, *, max_block_bytes,
                           vmem_limit_bytes, min_grid_steps):
    N, C, H, W = x_nchw.shape
    assert weight.shape == (C, C) and bias.shape == (C,)
    HW = H * W
    dtype = x_nchw.dtype
    itemsize = jnp.dtype(dtype).itemsize

    # Transpose-free glue: contiguous reshape (channels on sublanes, spatial
    # on the lane axis), padded up to a multiple of 128 lanes if ragged.
    HW_pad = ((HW + 127) // 128) * 128
    x_r = x_nchw.reshape(N, C, HW)
    if HW_pad != HW:
        x_r = jnp.pad(x_r, ((0, 0), (0, 0), (0, HW_pad - HW)))
    b_col = bias.reshape(C, 1)

    tile_hw = _pick_tile_hw(HW_pad, C, itemsize, max_block_bytes, N,
                            min_grid_steps)
    grid = (N, HW_pad // tile_hw)

    bf16_dot = (C >= 256) or (dtype == jnp.bfloat16)
    kernel = partial(_residual_conv1x1_kernel, bf16_dot=bf16_dot)

    out_r = pl.pallas_call(
        kernel,
        out_shape=jax.ShapeDtypeStruct((N, C, HW_pad), dtype),
        grid_spec=pltpu.PrefetchScalarGridSpec(
            num_scalar_prefetch=0,
            grid=grid,
            in_specs=[
                # (None -> squeezed batch dim) x block: (C, tile_hw)
                pl.BlockSpec((None, C, tile_hw), lambda n, s: (n, 0, s)),
                pl.BlockSpec((C, C), lambda n, s: (0, 0)),   # resident weight
                pl.BlockSpec((C, 1), lambda n, s: (0, 0)),   # resident bias
            ],
            out_specs=pl.BlockSpec((None, C, tile_hw), lambda n, s: (n, 0, s)),
        ),
        compiler_params=pltpu.CompilerParams(
            dimension_semantics=("parallel", "parallel"),
            vmem_limit_bytes=vmem_limit_bytes,
        ),
    )(x_r, weight, b_col)

    if HW_pad != HW:
        out_r = out_r[:, :, :HW]
    return out_r.reshape(N, C, H, W)


def residual_conv1x1(x_nchw, weight, bias):
    """Computes Conv2d_1x1(x) + x (the Residual wrapper) with NCHW input."""
    max_block_bytes, vmem_limit_bytes, min_steps = _hw_budgets()
    return _residual_conv1x1_impl(
        x_nchw, weight, bias,
        max_block_bytes=max_block_bytes,
        vmem_limit_bytes=vmem_limit_bytes,
        min_grid_steps=min_steps)


# ---------------------------------------------------------------------------
# Self-test
# ---------------------------------------------------------------------------
if __name__ == "__main__":
    key = jax.random.PRNGKey(0)
    kx, kw, kb, k2x, k2w, k2b = jax.random.split(key, 6)

    # --- main case: batch=2, channels=4, spatial=16x16 ---------------------
    N, C, H, W = 2, 4, 16, 16
    x = jax.random.normal(kx, (N, C, H, W), dtype=jnp.float32)

    fan_in = C
    bound = 1.0 / (fan_in ** 0.5)
    weight = jax.random.uniform(kw, (C, C), minval=-bound, maxval=bound,
                                dtype=jnp.float32)
    bias = jax.random.uniform(kb, (C,), minval=-bound, maxval=bound,
                              dtype=jnp.float32)

    # Pure-JAX reference: fn(x) + x
    ref = jnp.einsum("nchw,oc->nohw", x, weight) + bias[None, :, None, None] + x
    ref = jax.block_until_ready(ref)

    out = jax.block_until_ready(residual_conv1x1(x, weight, bias))
    assert out.shape == x.shape and out.dtype == x.dtype
    assert jnp.allclose(out, ref, atol=1e-5, rtol=1e-5), "mismatch vs reference"

    # --- ragged spatial case exercises the pad-to-128-lanes path -----------
    N2, C2, H2, W2 = 2, 8, 10, 10
    x2 = jax.random.normal(k2x, (N2, C2, H2, W2), dtype=jnp.float32)
    w2 = jax.random.uniform(k2w, (C2, C2), minval=-0.3, maxval=0.3,
                            dtype=jnp.float32)
    b2 = jax.random.uniform(k2b, (C2,), minval=-0.3, maxval=0.3,
                            dtype=jnp.float32)
    ref2 = jnp.einsum("nchw,oc->nohw", x2, w2) + b2[None, :, None, None] + x2
    out2 = jax.block_until_ready(residual_conv1x1(x2, w2, b2))
    assert out2.shape == x2.shape
    assert jnp.allclose(out2, ref2, atol=1e-5, rtol=1e-5), "ragged-HW mismatch"

    print("KERNEL_OK")
</pallas_src>

<mosaic_0001>
module attributes {stable_mosaic.version = 11 : i64} {
  func.func @_residual_conv1x1_kernel(%arg0: i32, %arg1: i32, %arg2: memref<1x4x256xf32, #tpu.memory_space<vmem>>, %arg3: memref<4x4xf32, #tpu.memory_space<vmem>>, %arg4: memref<4x1xf32, #tpu.memory_space<vmem>>, %arg5: memref<1x4x256xf32, #tpu.memory_space<vmem>>) attributes {dimension_semantics = [#tpu.dimension_semantics<parallel>, #tpu.dimension_semantics<parallel>], iteration_bounds = array<i64: 2, 1>, scalar_prefetch = 0 : i64, scratch_operands = 0 : i64, tpu.core_type = #tpu.core_type<tc>, window_params = [{transform_indices = @transform_0, window_bounds = array<i64: 1, 4, 256>}, {pipeline_mode = #tpu.pipeline_mode<synchronous>, transform_indices = @transform_1, window_bounds = array<i64: 4, 4>}, {pipeline_mode = #tpu.pipeline_mode<synchronous>, transform_indices = @transform_2, window_bounds = array<i64: 4, 1>}, {transform_indices = @transform_3, window_bounds = array<i64: 1, 4, 256>}]} {
    %c0 = arith.constant 0 : index
    %c0_0 = arith.constant 0 : index
    %c0_1 = arith.constant 0 : index
    %0 = vector.load %arg2[%c0, %c0_0, %c0_1] : memref<1x4x256xf32, #tpu.memory_space<vmem>>, vector<1x4x256xf32>
    %1 = vector.shape_cast %0 : vector<1x4x256xf32> to vector<4x256xf32>
    %c0_2 = arith.constant 0 : index
    %c0_3 = arith.constant 0 : index
    %2 = vector.load %arg3[%c0_2, %c0_3] : memref<4x4xf32, #tpu.memory_space<vmem>>, vector<4x4xf32>
    %cst = arith.constant dense<0.000000e+00> : vector<4x256xf32>
    %3 = tpu.matmul %2, %1, %cst {dimension_numbers = #tpu.dot_dimension_numbers<[1], [0], [0], [1], [0, 0, 1, 1], [], []>} : vector<4x4xf32>, vector<4x256xf32>, vector<4x256xf32> -> vector<4x256xf32>
    %c0_4 = arith.constant 0 : index
    %c0_5 = arith.constant 0 : index
    %4 = vector.load %arg4[%c0_4, %c0_5] : memref<4x1xf32, #tpu.memory_space<vmem>>, vector<4x1xf32>
    %5 = vector.broadcast %4 : vector<4x1xf32> to vector<4x256xf32>
    %6 = arith.addf %3, %5 : vector<4x256xf32>
    %7 = arith.addf %6, %1 : vector<4x256xf32>
    %c0_6 = arith.constant 0 : index
    %c0_7 = arith.constant 0 : index
    %c0_8 = arith.constant 0 : index
    %8 = vector.load %arg5[%c0_6, %c0_7, %c0_8] : memref<1x4x256xf32, #tpu.memory_space<vmem>>, vector<1x4x256xf32>
    %9 = vector.shape_cast %8 : vector<1x4x256xf32> to vector<4x256xf32>
    %10 = vector.shape_cast %7 : vector<4x256xf32> to vector<1x4x256xf32>
    tpu.vector_store %arg5[%c0_6, %c0_7, %c0_8], %10 {strides = array<i32>} : memref<1x4x256xf32, #tpu.memory_space<vmem>>, vector<1x4x256xf32>,
    return
  }
  func.func @transform_0(%arg0: i32, %arg1: i32) -> (i32, i32, i32) {
    %c0_i32 = arith.constant 0 : i32
    %c0_i32_0 = arith.constant 0 : i32
    return %arg0, %c0_i32, %arg1 : i32, i32, i32
  }
  func.func @transform_1(%arg0: i32, %arg1: i32) -> (i32, i32) {
    %c0_i32 = arith.constant 0 : i32
    %c0_i32_0 = arith.constant 0 : i32
    %c0_i32_1 = arith.constant 0 : i32
    return %c0_i32, %c0_i32_0 : i32, i32
  }
  func.func @transform_2(%arg0: i32, %arg1: i32) -> (i32, i32) {
    %c0_i32 = arith.constant 0 : i32
    %c0_i32_0 = arith.constant 0 : i32
    %c0_i32_1 = arith.constant 0 : i32
    return %c0_i32, %c0_i32_0 : i32, i32
  }
  func.func @transform_3(%arg0: i32, %arg1: i32) -> (i32, i32, i32) {
    %c0_i32 = arith.constant 0 : i32
    %c0_i32_0 = arith.constant 0 : i32
    return %arg0, %c0_i32, %arg1 : i32, i32, i32
  }
}

</mosaic_0001>

<bundles_post_ra>
// kernel: _residual_conv1x1_impl.1
= control target key start
LH: loop header
LB: loop body
LE: loop exit
PB: predicated region body
PF: predicated region fallthrough
CT: control target
= control target key end

     0   :  { %s485_s12 = smov 0   ;;  %s487_s13 = smov 0   ;;  %s524_s0 = inlined_call_operand.vmem [shape: f32[2,4,256], index: 0, kind: input, shape index: {}]   ;;  %s525_s1 = inlined_call_operand.vmem [shape: f32[4,4], index: 1, kind: input, shape index: {}]   ;;  %s526_s2 = inlined_call_operand.vmem [shape: f32[4,1], index: 2, kind: input, shape index: {}]   ;;  %s527_s3 = inlined_call_operand.vmem [shape: f32[2,4,256], index: 3, kind: output, shape index: {}]  }
   0x1   :  { %s489_s14 = smov 0  }
   0x2 LB: > { %s25_s15 = sadd.s32 1, %s457_s13  ;;  %p399_p0 = scmp.ge.s32.totalorder %s461_s14, 1  ;;  %s461_s14 = sphi %s489_s14, %s13_s14   ;;  %s457_s13 = sphi %s487_s13, %s529_s13   ;;  %s453_s12 = sphi %s485_s12, %s528_s12  }
   0x3   : > { %p27_p1 = scmp.ge.s32.totalorder %s25_s15, 2  ;;  %p158_p2 = scmp.lt.s32.totalorder %s461_s14, 3 }
   0x5   : > { %s531_s15 = smov (%p27_p1, %s25_s15), 0  ;;  %p159_p3 = pnand %p399_p0, %p158_p2 }
   0x6   : > { %p191_p4 = scmp.lt.s32.totalorder (!%p159_p3), %s453_s12, 1  ;;  %v463_v0 = vmov (!%p159_p3), 0.0   ;;  %v212_v1 = vld [vmem:[%s526_s2] sm:$0xf] (!%p159_p3)  ;;  %v464_v2 = vmov (!%p159_p3), 0   ;;  %vm224_vm0 = vcmask (!%p159_p3), 1043456  }
   0x7   : > { %162 = sbr.rel (%p159_p3) target bundleno = 242 (0xf2), region = 32  ;;  %293 = vmatprep.mubr.f32.mxu0 (!%p159_p3), %v463_v0  ;;  %437 = vset.pattern.permute.xlu0 (!%p159_p3), %v464_v2  ;;  %v211_v5 = vld [vmem:[%s525_s1] sm:$0xf] (!%p159_p3)  ;;  %vm220_vm1 = vcmask (!%p159_p3), 31744  }
   0x8   : > { %215 = vperm.xlu0 (!%p159_p3), %437, %v212_v1  }
   0xe   : > { %s533_s12 = smov (!%p191_p4, %s453_s12), 1 }
   0xf   : > { %s409_s18 = sshll.u32 %s533_s12, 3 }
  0x10   : > { %s198_s21 = scalar_lea.vmem %s524_s0, %s409_s18  ;;  %s208_s26 = scalar_lea.vmem %s527_s3, %s409_s18 }
  0x11   : > { %v210_v3 = vld [vmem:[%s198_s21] sm:$0xff] }
  0x12   : > { %v219_v4 = vcombine.high %v210_v3, %v210_v3 }
  0x14   : > { %404 = vmatprep.subr.msk.mxu0 %vm224_vm0, %v219_v4 }
  0x15   : > { %405 = vmatpush1.msk.msra.mxu0 %vm224_vm0, %v210_v3 }
  0x16   : > { %406 = vmatmul.mubr.msk.f32.vlgmr.msra.gmra.mrb[0].mxu0 %vm220_vm1, %v211_v5 }
  0x87   : > { %v216_v6 = vpop.permute.xlu0 %215 }
  0xe9   : > { %v295_v7 = vpop.f32.mrb[0].mxu0 }
  0xea   : > { %v296_v8 = vadd.f32 %v295_v7, %v216_v6  ;;  %v297_v9 = vpop.f32.mrb[1].mxu0 }
  0xeb   : > { %v298_v10 = vadd.f32 %v297_v9, %v216_v6 }
  0xec   : > { %v301_v11 = vadd.f32 %v296_v8, %v210_v3 }
  0xed   : > { %v302_v12 = vadd.f32 %v298_v10, %v219_v4 }
  0xef   : > { %v305_v13 = vcombine.low %v301_v11, %v302_v12 }
  0xf1   : > { %307 = vst [vmem:[%s208_s26] sm:$0xff] %v305_v13 }
  0xf2 PF: > { %s13_s14 = sadd.s32 1, %s461_s14   ;;  %s528_s12 = smov %s457_s13 }
  0xf3   : > { %p10_p5 = scmp.ge.s32.totalorder %s13_s14, 4   ;;  %s529_s13 = smov %s531_s15 }
  0xf5   :  { %12 = sbr.rel (!%p10_p5) target bundleno = 2 (0x2), region = 62 }

</bundles_post_ra>
